<compile_context>
chip_gen: v7x
topology: tpu7x:2x2x1
jax: 0.10.0
libtpu: 0.0.40
codegen_flags: <defaults>
</compile_context>

<pallas_src>
import jax
import jax.numpy as jnp
from jax.experimental import pallas as pl
from jax.experimental.pallas import tpu as pltpu

_LANES = 128
_SUBLANES = 8
# Max rows-of-128 per streamed block (bb * tile_rows).  8192 rows == 4 MiB per
# f32 input block; 3 inputs x 2 pipeline buffers == 24 MiB.
_MAX_BLOCK_ROWS = 8192
# Cap on images batched into one block (keeps the double-buffered (bb,8,128)
# output slabs small).
_MAX_BATCH_BLOCK = 128
_VMEM_LIMIT_BYTES = 40 * 1024 * 1024


def _round_up(x, m):
    return (x + m - 1) // m * m


def _largest_divisor_at_most(n, cap):
    cap = max(1, min(n, cap))
    for d in range(cap, 0, -1):
        if n % d == 0:
            return d
    return 1


def _make_mse_kernel(bb, tile_rows, rows_valid):
    """Builds the per-tile kernel.

    Block shapes: inputs (bb, tile_rows, 128); outputs (bb, 8, 128).
    `rows_valid` (static) is the number of valid rows in the (unpadded) input
    when the grid's row coverage overhangs it; None means no masking needed.
    """
    k = tile_rows // _SUBLANES

    def kernel(pred_ref, tgt_ref, mask_ref, loss_ref, m_ref):
        t = pl.program_id(1)

        # Output blocks are VMEM-resident across the reduction axis (their
        # block index is constant in t): init at t == 0, accumulate directly.
        @pl.when(t == 0)
        def _init():
            loss_ref[...] = jnp.zeros_like(loss_ref)
            m_ref[...] = jnp.zeros_like(m_ref)

        # In-kernel cast to f32 (inputs arrive in their native dtype; f32 math
        # also required on v5e which has no bf16 VALU).
        pred = pred_ref[...].astype(jnp.float32)   # (bb, tile_rows, 128)
        tgt = tgt_ref[...].astype(jnp.float32)
        msk = mask_ref[...].astype(jnp.float32)

        res = pred - tgt
        sq = msk * res * res

        if rows_valid is not None:
            # The last row-tile overhangs the unpadded input: zero the
            # out-of-range rows for BOTH the loss and the mask-count sums
            # (the overhang contents are unspecified).  Cheap VPU work.
            start = t * tile_rows
            rid = jax.lax.broadcasted_iota(jnp.int32, (1, tile_rows, 1), 1)
            valid = rid < (rows_valid - start)
            sq = jnp.where(valid, sq, 0.0)
            msk = jnp.where(valid, msk, 0.0)

        # Fold each image's tile into one (8, 128) vreg with pure VPU adds
        # (sublane-split reshape is layout-free; no XLU reduce in hot loop).
        loss_ref[...] += jnp.sum(sq.reshape(bb, k, _SUBLANES, _LANES), axis=1)
        m_ref[...] += jnp.sum(msk.reshape(bb, k, _SUBLANES, _LANES), axis=1)

    return kernel


def _per_image_sums(prediction, target, mask,
                    max_block_rows=_MAX_BLOCK_ROWS,
                    max_batch_block=_MAX_BATCH_BLOCK):
    """Returns (image_loss, M), each shape (B,), f32."""
    B, H, W = prediction.shape
    hw = H * W
    max_block_rows = max(_SUBLANES, _round_up(max_block_rows, _SUBLANES))

    rows = pl.cdiv(hw, _LANES)                    # 128-lane rows per image
    rows8 = _round_up(rows, _SUBLANES)

    # Balanced row tiles: fewest tiles respecting the block budget, then
    # evenly sized (multiple-of-8) tiles -> padding/overhang is at most a few
    # sublane rows.
    num_tiles = pl.cdiv(rows8, max_block_rows)
    tile_rows = _round_up(pl.cdiv(rows8, num_tiles), _SUBLANES)
    num_tiles = pl.cdiv(rows8, tile_rows)

    # Batch several small images per grid step so each DMA step still moves a
    # few MiB (amortizes the per-step overhead).  bb must divide B.
    bb = _largest_divisor_at_most(
        B, min(max_batch_block, max_block_rows // tile_rows))

    if hw == rows * _LANES and rows % _SUBLANES == 0:
        # Lane/sublane aligned: no wrapper-side pad copy is materialized; any
        # row overhang of the last tile is masked inside the kernel.
        rows_store = rows
        rows_valid = rows if num_tiles * tile_rows > rows else None
    else:
        # Ragged H*W: zero-pad up to full tile coverage (zero mask rows
        # contribute nothing to either sum).
        rows_store = num_tiles * tile_rows
        rows_valid = None

    def _prep(x):
        flat = x.reshape(B, hw)
        pad = rows_store * _LANES - hw
        if pad:
            flat = jnp.pad(flat, ((0, 0), (0, pad)))
        return flat.reshape(B, rows_store, _LANES)

    pred_p = _prep(prediction)
    tgt_p = _prep(target)
    mask_p = _prep(mask)

    in_spec = pl.BlockSpec((bb, tile_rows, _LANES), lambda b, t: (b, t, 0))
    out_spec = pl.BlockSpec((bb, _SUBLANES, _LANES), lambda b, t: (b, 0, 0))

    kernel = _make_mse_kernel(bb, tile_rows, rows_valid)

    # TODO(synk): for v7x with B == 1, split the row-tile axis across the two
    # TensorCores (pltpu.CORE_PARALLEL or an explicit core axis emitting
    # per-core partial slabs); the "parallel" batch axis already covers B >= 2.
    loss_parts, m_parts = pl.pallas_call(
        kernel,
        out_shape=(
            jax.ShapeDtypeStruct((B, _SUBLANES, _LANES), jnp.float32),
            jax.ShapeDtypeStruct((B, _SUBLANES, _LANES), jnp.float32),
        ),
        grid_spec=pltpu.PrefetchScalarGridSpec(
            num_scalar_prefetch=0,
            grid=(B // bb, num_tiles),
            in_specs=[in_spec, in_spec, in_spec],
            out_specs=(out_spec, out_spec),
        ),
        compiler_params=pltpu.CompilerParams(
            dimension_semantics=("parallel", "arbitrary"),
            vmem_limit_bytes=_VMEM_LIMIT_BYTES,
        ),
    )(pred_p, tgt_p, mask_p)

    # Tiny (B, 8, 128) final reduction done in plain JAX.
    image_loss = jnp.sum(loss_parts, axis=(1, 2))
    M = jnp.sum(m_parts, axis=(1, 2))
    return image_loss, M


def mse_loss(prediction, target, mask, reduction="batch-based",
             max_block_rows=_MAX_BLOCK_ROWS,
             max_batch_block=_MAX_BATCH_BLOCK):
    """JAX/Pallas equivalent of the PyTorch MSELoss module's forward."""
    image_loss, M = _per_image_sums(
        prediction, target, mask,
        max_block_rows=max_block_rows, max_batch_block=max_batch_block)
    M2 = 2.0 * M

    if reduction == "batch-based":
        divisor = jnp.sum(M2)
        total = jnp.sum(image_loss)
        safe = jnp.where(divisor == 0, jnp.float32(1.0), divisor)
        return jnp.where(divisor == 0, jnp.float32(0.0), total / safe)
    else:
        # image-based: divide each image loss by its (2*M) where nonzero, keep
        # it unchanged where M == 0, then mean over images (matches torch's
        # reduction_image_based). Scalar glue in plain JAX.
        safe = jnp.where(M2 != 0, M2, jnp.float32(1.0))
        per_image = jnp.where(M2 != 0, image_loss / safe, image_loss)
        return jnp.mean(per_image)


class MSELoss:
    def __init__(self, reduction="batch-based"):
        self._reduction = reduction

    def __call__(self, prediction, target, mask):
        return mse_loss(prediction, target, mask, reduction=self._reduction)


def _reference_batch_based(prediction, target, mask):
    p = prediction.astype(jnp.float32)
    t = target.astype(jnp.float32)
    m = mask.astype(jnp.float32)
    M = jnp.sum(m, axis=(1, 2))
    res = p - t
    image_loss = jnp.sum(m * res * res, axis=(1, 2))
    divisor = jnp.sum(2.0 * M)
    safe = jnp.where(divisor == 0, 1.0, divisor)
    return jnp.where(divisor == 0, 0.0, jnp.sum(image_loss) / safe)


def _reference_image_based(prediction, target, mask):
    p = prediction.astype(jnp.float32)
    t = target.astype(jnp.float32)
    m = mask.astype(jnp.float32)
    M2 = 2.0 * jnp.sum(m, axis=(1, 2))
    res = p - t
    image_loss = jnp.sum(m * res * res, axis=(1, 2))
    safe = jnp.where(M2 != 0, M2, 1.0)
    per_image = jnp.where(M2 != 0, image_loss / safe, image_loss)
    return jnp.mean(per_image)


if __name__ == "__main__":
    key = jax.random.PRNGKey(0)
    k1, k2, k3, k4, k5, k6 = jax.random.split(key, 6)

    # 1) Small f32 case (exercises the zero-padded ragged path, bb = 2).
    B, H, W = 2, 16, 16
    prediction = jax.random.normal(k1, (B, H, W), dtype=jnp.float32)
    target = jax.random.normal(k2, (B, H, W), dtype=jnp.float32)
    mask = (jax.random.uniform(k3, (B, H, W)) < 0.7).astype(jnp.float32)

    loss_fn = MSELoss(reduction="batch-based")
    loss = jax.block_until_ready(loss_fn(prediction, target, mask))
    ref = jax.block_until_ready(_reference_batch_based(prediction, target, mask))
    assert jnp.allclose(loss, ref, rtol=1e-4, atol=1e-6), (loss, ref)

    loss_img = jax.block_until_ready(
        MSELoss(reduction="image-based")(prediction, target, mask))
    ref_img = _reference_image_based(prediction, target, mask)
    assert jnp.allclose(loss_img, ref_img, rtol=1e-4, atol=1e-6), (loss_img, ref_img)

    # 2) Degenerate: all-zero mask -> loss must be exactly 0.
    zero_mask = jnp.zeros((B, H, W), dtype=jnp.float32)
    loss_zero = jax.block_until_ready(loss_fn(prediction, target, zero_mask))
    assert jnp.allclose(loss_zero, 0.0, atol=1e-7), loss_zero

    # 3) Narrow dtypes (bf16 pred/target, bool mask) on an aligned shape
    #    (exercises the no-pad path; halves HBM traffic in production).
    B2, H2, W2 = 2, 32, 32
    p_bf = jax.random.normal(k4, (B2, H2, W2), dtype=jnp.bfloat16)
    t_bf = jax.random.normal(k5, (B2, H2, W2), dtype=jnp.bfloat16)
    m_b = jax.random.uniform(k6, (B2, H2, W2)) < 0.5
    loss_bf = jax.block_until_ready(loss_fn(p_bf, t_bf, m_b))
    ref_bf = _reference_batch_based(p_bf, t_bf, m_b)
    assert jnp.allclose(loss_bf, ref_bf, rtol=1e-4, atol=1e-6), (loss_bf, ref_bf)

    # 4) Ragged last row-tile handled via in-kernel masking (no wrapper pad):
    #    force multi-tile rows with a small max_block_rows.
    B3, H3, W3 = 2, 40, 128
    p3 = jax.random.normal(k1, (B3, H3, W3), dtype=jnp.float32)
    t3 = jax.random.normal(k2, (B3, H3, W3), dtype=jnp.float32)
    m3 = (jax.random.uniform(k3, (B3, H3, W3)) < 0.6).astype(jnp.float32)
    loss3 = jax.block_until_ready(
        mse_loss(p3, t3, m3, reduction="batch-based", max_block_rows=16))
    ref3 = _reference_batch_based(p3, t3, m3)
    assert jnp.allclose(loss3, ref3, rtol=1e-4, atol=1e-6), (loss3, ref3)

    print("KERNEL_OK")
</pallas_src>

<mosaic_0001>
module attributes {stable_mosaic.version = 11 : i64} {
  func.func @kernel(%arg0: i32, %arg1: i32, %arg2: memref<2x8x128xf32, #tpu.memory_space<vmem>>, %arg3: memref<2x8x128xf32, #tpu.memory_space<vmem>>, %arg4: memref<2x8x128xf32, #tpu.memory_space<vmem>>, %arg5: memref<2x8x128xf32, #tpu.memory_space<vmem>>, %arg6: memref<2x8x128xf32, #tpu.memory_space<vmem>>) attributes {dimension_semantics = [#tpu.dimension_semantics<parallel>, #tpu.dimension_semantics<arbitrary>], iteration_bounds = array<i64: 1, 1>, scalar_prefetch = 0 : i64, scratch_operands = 0 : i64, tpu.core_type = #tpu.core_type<tc>, window_params = [{transform_indices = @transform_0, window_bounds = array<i64: 2, 8, 128>}, {transform_indices = @transform_1, window_bounds = array<i64: 2, 8, 128>}, {transform_indices = @transform_2, window_bounds = array<i64: 2, 8, 128>}, {transform_indices = @transform_3, window_bounds = array<i64: 2, 8, 128>}, {transform_indices = @transform_4, window_bounds = array<i64: 2, 8, 128>}]} {
    %c0_i32 = arith.constant 0 : i32
    %0 = arith.cmpi eq, %arg1, %c0_i32 : i32
    %1 = arith.extui %0 : i1 to i32
    %c0_i32_0 = arith.constant 0 : i32
    %2 = arith.cmpi ne, %1, %c0_i32_0 : i32
    scf.if %2 {
      %cst_22 = arith.constant 0.000000e+00 : f32
      %19 = vector.broadcast %cst_22 : f32 to vector<2x8x128xf32>
      %c0_23 = arith.constant 0 : index
      %c0_24 = arith.constant 0 : index
      %c0_25 = arith.constant 0 : index
      %20 = vector.load %arg5[%c0_23, %c0_24, %c0_25] : memref<2x8x128xf32, #tpu.memory_space<vmem>>, vector<2x8x128xf32>
      tpu.vector_store %arg5[%c0_23, %c0_24, %c0_25], %19 {strides = array<i32>} : memref<2x8x128xf32, #tpu.memory_space<vmem>>, vector<2x8x128xf32>,
      %cst_26 = arith.constant 0.000000e+00 : f32
      %21 = vector.broadcast %cst_26 : f32 to vector<2x8x128xf32>
      %c0_27 = arith.constant 0 : index
      %c0_28 = arith.constant 0 : index
      %c0_29 = arith.constant 0 : index
      %22 = vector.load %arg6[%c0_27, %c0_28, %c0_29] : memref<2x8x128xf32, #tpu.memory_space<vmem>>, vector<2x8x128xf32>
      tpu.vector_store %arg6[%c0_27, %c0_28, %c0_29], %21 {strides = array<i32>} : memref<2x8x128xf32, #tpu.memory_space<vmem>>, vector<2x8x128xf32>,
    } else {
    }
    %c0 = arith.constant 0 : index
    %c0_1 = arith.constant 0 : index
    %c0_2 = arith.constant 0 : index
    %3 = vector.load %arg2[%c0, %c0_1, %c0_2] : memref<2x8x128xf32, #tpu.memory_space<vmem>>, vector<2x8x128xf32>
    %c0_3 = arith.constant 0 : index
    %c0_4 = arith.constant 0 : index
    %c0_5 = arith.constant 0 : index
    %4 = vector.load %arg3[%c0_3, %c0_4, %c0_5] : memref<2x8x128xf32, #tpu.memory_space<vmem>>, vector<2x8x128xf32>
    %c0_6 = arith.constant 0 : index
    %c0_7 = arith.constant 0 : index
    %c0_8 = arith.constant 0 : index
    %5 = vector.load %arg4[%c0_6, %c0_7, %c0_8] : memref<2x8x128xf32, #tpu.memory_space<vmem>>, vector<2x8x128xf32>
    %6 = arith.subf %3, %4 : vector<2x8x128xf32>
    %7 = arith.mulf %5, %6 : vector<2x8x128xf32>
    %8 = arith.mulf %7, %6 : vector<2x8x128xf32>
    %c0_9 = arith.constant 0 : index
    %c0_10 = arith.constant 0 : index
    %c0_11 = arith.constant 0 : index
    %9 = vector.load %arg5[%c0_9, %c0_10, %c0_11] : memref<2x8x128xf32, #tpu.memory_space<vmem>>, vector<2x8x128xf32>
    %10 = vector.shape_cast %8 : vector<2x8x128xf32> to vector<2x1x8x128xf32>
    %cst = arith.constant dense<0.000000e+00> : vector<2x8x128xf32>
    %11 = vector.multi_reduction <add>, %10, %cst [1] : vector<2x1x8x128xf32> to vector<2x8x128xf32>
    %12 = arith.addf %9, %11 : vector<2x8x128xf32>
    %c0_12 = arith.constant 0 : index
    %c0_13 = arith.constant 0 : index
    %c0_14 = arith.constant 0 : index
    %13 = vector.load %arg5[%c0_12, %c0_13, %c0_14] : memref<2x8x128xf32, #tpu.memory_space<vmem>>, vector<2x8x128xf32>
    tpu.vector_store %arg5[%c0_12, %c0_13, %c0_14], %12 {strides = array<i32>} : memref<2x8x128xf32, #tpu.memory_space<vmem>>, vector<2x8x128xf32>,
    %c0_15 = arith.constant 0 : index
    %c0_16 = arith.constant 0 : index
    %c0_17 = arith.constant 0 : index
    %14 = vector.load %arg6[%c0_15, %c0_16, %c0_17] : memref<2x8x128xf32, #tpu.memory_space<vmem>>, vector<2x8x128xf32>
    %15 = vector.shape_cast %5 : vector<2x8x128xf32> to vector<2x1x8x128xf32>
    %cst_18 = arith.constant dense<0.000000e+00> : vector<2x8x128xf32>
    %16 = vector.multi_reduction <add>, %15, %cst_18 [1] : vector<2x1x8x128xf32> to vector<2x8x128xf32>
    %17 = arith.addf %14, %16 : vector<2x8x128xf32>
    %c0_19 = arith.constant 0 : index
    %c0_20 = arith.constant 0 : index
    %c0_21 = arith.constant 0 : index
    %18 = vector.load %arg6[%c0_19, %c0_20, %c0_21] : memref<2x8x128xf32, #tpu.memory_space<vmem>>, vector<2x8x128xf32>
    tpu.vector_store %arg6[%c0_19, %c0_20, %c0_21], %17 {strides = array<i32>} : memref<2x8x128xf32, #tpu.memory_space<vmem>>, vector<2x8x128xf32>,
    return
  }
  func.func @transform_0(%arg0: i32, %arg1: i32) -> (i32, i32, i32) {
    %c0_i32 = arith.constant 0 : i32
    %c0_i32_0 = arith.constant 0 : i32
    return %arg0, %arg1, %c0_i32 : i32, i32, i32
  }
  func.func @transform_1(%arg0: i32, %arg1: i32) -> (i32, i32, i32) {
    %c0_i32 = arith.constant 0 : i32
    %c0_i32_0 = arith.constant 0 : i32
    return %arg0, %arg1, %c0_i32 : i32, i32, i32
  }
  func.func @transform_2(%arg0: i32, %arg1: i32) -> (i32, i32, i32) {
    %c0_i32 = arith.constant 0 : i32
    %c0_i32_0 = arith.constant 0 : i32
    return %arg0, %arg1, %c0_i32 : i32, i32, i32
  }
  func.func @transform_3(%arg0: i32, %arg1: i32) -> (i32, i32, i32) {
    %c0_i32 = arith.constant 0 : i32
    %c0_i32_0 = arith.constant 0 : i32
    %c0_i32_1 = arith.constant 0 : i32
    return %arg0, %c0_i32, %c0_i32_0 : i32, i32, i32
  }
  func.func @transform_4(%arg0: i32, %arg1: i32) -> (i32, i32, i32) {
    %c0_i32 = arith.constant 0 : i32
    %c0_i32_0 = arith.constant 0 : i32
    %c0_i32_1 = arith.constant 0 : i32
    return %arg0, %c0_i32, %c0_i32_0 : i32, i32, i32
  }
}

</mosaic_0001>

<bundles_post_ra>
// kernel: tpu_custom_call.1
= control target key start
LH: loop header
LB: loop body
LE: loop exit
PB: predicated region body
PF: predicated region fallthrough
CT: control target
= control target key end

     0   :  { %10 = vsyncpa [#allocation3], 0  ;;  %s369_s0 = inlined_call_operand.hbm [shape: f32[2,8,128], index: 0, kind: input, shape index: {}]   ;;  %s370_s1 = inlined_call_operand.hbm [shape: f32[2,8,128], index: 1, kind: input, shape index: {}]   ;;  %s371_s2 = inlined_call_operand.hbm [shape: f32[2,8,128], index: 2, kind: input, shape index: {}]   ;;  %s372_s3 = inlined_call_operand.hbm [shape: f32[2,8,128], index: 3, kind: output, shape index: {0}]   ;;  %s373_s4 = inlined_call_operand.hbm [shape: f32[2,8,128], index: 4, kind: output, shape index: {1}]  }
   0x1   :  { %11 = vsyncpa [#allocation6], 0 }
   0x2   :  { %12 = vsyncpa [#allocation4], 0 }
   0x3   :  { %13 = vsyncpa [#allocation10], 0  ;;  %s255_s15 = smov [#allocation5]   ;;  %s256_s17 = smov [#allocation2]  }
   0x4   :  { %s31_s16 = sshll.u32 %s255_s15, 4  ;;  %s19_s18 = sshll.u32 %s256_s17, 4  ;;  %s32_s16 = int_to_ptr.vmem [resolvable:$true] %s31_s16  ;;  %s287_s18 = int_to_ptr.vmem [resolvable:$true] %s19_s18 }
   0x5   :  { %s137_s21 = scalar_lea.hbm %s370_s1, 256 }
   0x6   :  { %p138_p0 = scmp.ne.s32.totalorder %s370_s1, %s137_s21  ;;  %p141_p1 = scmp.lt.u32.totalorder %s137_s21, %s370_s1 }
   0x8   :  { %p143_p2 = pnand %p141_p1, %p138_p0 }
   0xa   :  { %146 = shalt.err (!%p143_p2)
}
   0xb   :  { %s147_s26 = scalar_lea.vmem %s32_s16, 256  ;;  %p152_p4 = scmp.lt.s32.totalorder %s32_s16, %s32_s16 }
   0xc   :  { %p148_p3 = scmp.ne.s32.totalorder %s32_s16, %s147_s26  ;;  %p153_p5 = scmp.lt.s32.totalorder %s147_s26, %s147_s26 }
   0xe   :  { %p154_p6 = por %p153_p5, %p152_p4 }
  0x10   :  { %p155_p7 = pnand %p154_p6, %p148_p3 }
  0x12   :  { %158 = shalt.err (!%p155_p7)
}
  0x13   :  { %s257_s27 = smov 128   ;;  %s258_s28 = smov 8  }
  0x14   :  { %37 = dma.hbm_to_vmem [thread:$0]  %s370_s1, 256, %s32_s16, [#allocation6], %s257_s27, %s257_s27, %s258_s28  }
  0x15   :  { %s159_s7 = scalar_lea.hbm %s369_s0, 256 }
  0x16   :  { %p160_p8 = scmp.ne.s32.totalorder %s369_s0, %s159_s7  ;;  %p163_p9 = scmp.lt.u32.totalorder %s159_s7, %s369_s0 }
  0x18   :  { %p165_p10 = pnand %p163_p9, %p160_p8 }
  0x1a   :  { %168 = shalt.err (!%p165_p10)
}
  0x1b   :  { %s169_s12 = scalar_lea.vmem %s287_s18, 256  ;;  %p174_p12 = scmp.lt.s32.totalorder %s287_s18, %s287_s18 }
  0x1c   :  { %p170_p11 = scmp.ne.s32.totalorder %s287_s18, %s169_s12  ;;  %p175_p13 = scmp.lt.s32.totalorder %s169_s12, %s169_s12 }
  0x1e   :  { %p176_p0 = por %p175_p13, %p174_p12 }
  0x20   :  { %p177_p1 = pnand %p176_p0, %p170_p11 }
  0x22   :  { %180 = shalt.err (!%p177_p1)
}
  0x23   :  { %25 = dma.hbm_to_vmem [thread:$0]  %s369_s0, 256, %s287_s18, [#allocation3], %s257_s27, %s257_s27, %s258_s28  }
  0x24   :  { %s259_s14 = smov [#allocation7]   ;;  %s181_s19 = scalar_lea.hbm %s371_s2, 256 }
  0x25   :  { %s43_s15 = sshll.u32 %s259_s14, 4  ;;  %p182_p2 = scmp.ne.s32.totalorder %s371_s2, %s181_s19  ;;  %s44_s15 = int_to_ptr.vmem [resolvable:$true] %s43_s15 }
  0x26   :  { %p185_p3 = scmp.lt.u32.totalorder %s181_s19, %s371_s2 }
  0x28   :  { %p187_p4 = pnand %p185_p3, %p182_p2 }
  0x2a   :  { %190 = shalt.err (!%p187_p4)
}
  0x2b   :  { %s191_s24 = scalar_lea.vmem %s44_s15, 256  ;;  %p196_p6 = scmp.lt.s32.totalorder %s44_s15, %s44_s15 }
  0x2c   :  { %p192_p5 = scmp.ne.s32.totalorder %s44_s15, %s191_s24  ;;  %p197_p7 = scmp.lt.s32.totalorder %s191_s24, %s191_s24 }
  0x2e   :  { %p198_p8 = por %p197_p7, %p196_p6 }
  0x30   :  { %p199_p9 = pnand %p198_p8, %p192_p5 }
  0x32   :  { %202 = shalt.err (!%p199_p9)
}
  0x33   :  { %49 = dma.hbm_to_vmem [thread:$0]  %s371_s2, 256, %s44_s15, [#allocation6], %s257_s27, %s257_s27, %s258_s28  }
  0x34   :  { %247 = dma.done.wait [#allocation3], 256  }
  0x35   :  { %248 = vsyncadd [#allocation3], 4294967040 }
  0x36   :  { %249 = dma.done.wait [#allocation6], 512  }
  0x37   :  { %250 = vsyncadd [#allocation6], 4294966784  ;;  %s260_s25 = smov [#allocation9]   ;;  %v67_v0 = vld [vmem:[#allocation2] sm:$0xff]  ;;  %v69_v1 = vld [vmem:[#allocation5] sm:$0xff]  ;;  %s261_s2 = smov [#allocation8]  }
  0x38   :  { %s112_s26 = sshll.u32 %s260_s25, 4  ;;  %v71_v2 = vld [vmem:[#allocation7] sm:$0xff]  ;;  %v73_v3 = vsub.f32 %v67_v0, %v69_v1  ;;  %v68_v4 = vld [vmem:[#allocation2 + $0x8] sm:$0xff]  ;;  %v70_v5 = vld [vmem:[#allocation5 + $0x8] sm:$0xff]  ;;  %s100_s29 = sshll.u32 %s261_s2, 4  ;;  %s113_s26 = int_to_ptr.vmem [resolvable:$true] %s112_s26  ;;  %s101_s29 = int_to_ptr.vmem [resolvable:$true] %s100_s29 }
  0x39   :  { %v72_v6 = vld [vmem:[#allocation7 + $0x8] sm:$0xff]  ;;  %v74_v7 = vsub.f32 %v68_v4, %v70_v5  ;;  %93 = vst [vmem:[#allocation9] sm:$0xff] %v71_v2  ;;  %s203_s30 = scalar_lea.vmem %s113_s26, 256  ;;  %p208_p11 = scmp.lt.s32.totalorder %s113_s26, %s113_s26 }
  0x3a   :  { %v75_v8 = vmul.f32 %v73_v3, %v71_v2  ;;  %94 = vst [vmem:[#allocation9 + $0x8] sm:$0xff] %v72_v6  ;;  %p204_p10 = scmp.ne.s32.totalorder %s113_s26, %s203_s30  ;;  %p209_p12 = scmp.lt.s32.totalorder %s203_s30, %s203_s30 }
  0x3b   :  { %v76_v9 = vmul.f32 %v74_v7, %v72_v6 }
  0x3c   :  { %v77_v10 = vmul.f32 %v75_v8, %v73_v3  ;;  %p210_p13 = por %p209_p12, %p208_p11 }
  0x3e   :  { %p211_p0 = pnand %p210_p13, %p204_p10 }
  0x40   :  { %214 = shalt.err (!%p211_p0)
}
  0x41   :  { %s215_s7 = scalar_lea.hbm %s373_s4, 256 }
  0x42   :  { %p216_p1 = scmp.ne.s32.totalorder %s373_s4, %s215_s7  ;;  %p219_p2 = scmp.lt.u32.totalorder %s215_s7, %s373_s4 }
  0x44   :  { %p221_p3 = pnand %p219_p2, %p216_p1 }
  0x46   :  { %224 = shalt.err (!%p221_p3)
}
  0x47   :  { %118 = dma.vmem_to_hbm [thread:$0]  %s113_s26, 256, %s373_s4, [#allocation10], %s257_s27, %s257_s27, %s258_s28   ;;  %v78_v11 = vmul.f32 %v76_v9, %v74_v7  ;;  %85 = vst [vmem:[#allocation8] sm:$0xff] %v77_v10 }
  0x48   :  { %s225_s13 = scalar_lea.vmem %s101_s29, 256  ;;  %p230_p5 = scmp.lt.s32.totalorder %s101_s29, %s101_s29 }
  0x49   :  { %86 = vst [vmem:[#allocation8 + $0x8] sm:$0xff] %v78_v11  ;;  %p226_p4 = scmp.ne.s32.totalorder %s101_s29, %s225_s13  ;;  %p231_p6 = scmp.lt.s32.totalorder %s225_s13, %s225_s13 }
  0x4b   :  { %p232_p7 = por %p231_p6, %p230_p5 }
  0x4d   :  { %p233_p8 = pnand %p232_p7, %p226_p4 }
  0x4f   :  { %236 = shalt.err (!%p233_p8)
}
  0x50   :  { %s237_s16 = scalar_lea.hbm %s372_s3, 256 }
  0x51   :  { %p238_p9 = scmp.ne.s32.totalorder %s372_s3, %s237_s16  ;;  %p241_p10 = scmp.lt.u32.totalorder %s237_s16, %s372_s3 }
  0x53   :  { %p243_p11 = pnand %p241_p10, %p238_p9 }
  0x55   :  { %246 = shalt.err (!%p243_p11)
}
  0x56   :  { %106 = dma.vmem_to_hbm [thread:$0]  %s101_s29, 256, %s372_s3, [#allocation4], %s257_s27, %s257_s27, %s258_s28  }
  0x57   :  { %251 = dma.done.wait [#allocation4], 256  }
  0x58   :  { %252 = vsyncadd [#allocation4], 4294967040 }
  0x59   :  { %253 = dma.done.wait [#allocation10], 256  }
  0x5a   :  { %254 = vsyncadd [#allocation10], 4294967040 }
  0x5b   :  { %125 = vsyncpa [#allocation3], 1 }
  0x5c   :  { %126 = vsyncpa [#allocation6], 1 }
  0x5d   :  { %127 = vsyncpa [#allocation4], 1 }
  0x5e   :  { %128 = vsyncpa [#allocation10], 1 }

</bundles_post_ra>
